<compile_context>
chip_gen: v6e
topology: v6e:2x2x1
jax: 0.10.0
libtpu: 0.0.40
codegen_flags: <defaults>
</compile_context>

<pallas_src>
import functools

import jax
import jax.numpy as jnp
from jax.experimental import pallas as pl
from jax.experimental.pallas import tpu as pltpu


def _fused_mlp_kernel(*refs, n_hidden: int):
    # refs layout:
    #   refs[0]                      : x            [tm, K0]
    #   refs[1 + 2*i], refs[2 + 2*i] : (w_i, b_i)   [K_i, N_i], [1, N_i]
    #   refs[1 + 2*n_hidden]         : w_last       [1, K_last]  (pre-transposed row)
    #   refs[2 + 2*n_hidden]         : b_last       [1, 1]
    #   refs[-1]                     : out          [tm, 1]
    x_ref = refs[0]
    o_ref = refs[-1]
    p = refs[1:-1]

    h = x_ref[...]
    # Hidden layers: MXU matmul + bias + ReLU, all resident in VMEM.
    for i in range(n_hidden):
        w = p[2 * i][...]
        b = p[2 * i + 1][...]
        h = jnp.dot(h, w, preferred_element_type=jnp.float32) + b
        h = jnp.maximum(h, 0.0)

    # Final Linear(..., 1): VPU multiply + lane reduction (avoids an N=1
    # MXU matmul and its masked-store / drain penalty).
    w_last = p[2 * n_hidden][...]       # [1, K_last]
    b_last = p[2 * n_hidden + 1][...]   # [1, 1]
    out = jnp.sum(h * w_last, axis=-1, keepdims=True) + b_last
    o_ref[...] = out.astype(o_ref.dtype)


def prepare_mlp_params(params):
    """One-time flattening/reshaping into the layout the fused kernel wants.
    Do this once per model, NOT per forward call."""
    flat = []
    for w, b in params[:-1]:
        flat.append(w)                      # [in, out]
        flat.append(b.reshape(1, -1))       # [1, out]
    w_last, b_last = params[-1]
    flat.append(w_last.reshape(1, -1))      # [in, 1] -> [1, in] (out dim is 1)
    flat.append(b_last.reshape(1, 1))       # [1, 1]
    return tuple(flat)


def _pick_row_tile(M):
    # Small batches: one full-array slab (no per-step DMA bookkeeping).
    # Large batches: 256-row tiles -> double-buffered activation DMA and
    # bounded VMEM (fits v7x's 64 MiB as well as v5e/v6e's 128 MiB).
    if M <= 512:
        return M
    return 256


@functools.partial(jax.jit, static_argnames=("n_hidden",))
def _mlp_forward_jit(x, flat, *, n_hidden):
    M, K0 = x.shape
    tm = _pick_row_tile(M)
    grid = (pl.cdiv(M, tm),)

    # x / out are tiled over the batch grid axis; weights stay resident.
    in_specs = [pl.BlockSpec((tm, K0), lambda i: (i, 0))]
    bytes_accessed = x.size * x.dtype.itemsize
    for a in flat:
        in_specs.append(pl.BlockSpec(a.shape, lambda i: (0, 0)))
        bytes_accessed += a.size * a.dtype.itemsize
    bytes_accessed += M * x.dtype.itemsize  # [M, 1] output

    flops = 0
    for i in range(n_hidden):
        w = flat[2 * i]
        flops += 2 * M * w.shape[0] * w.shape[1]
    flops += 2 * M * flat[2 * n_hidden].shape[1]  # final dot-product layer

    out_spec = pl.BlockSpec((tm, 1), lambda i: (i, 0))
    kernel = functools.partial(_fused_mlp_kernel, n_hidden=n_hidden)

    return pl.pallas_call(
        kernel,
        grid=grid,
        out_shape=jax.ShapeDtypeStruct((M, 1), x.dtype),
        in_specs=in_specs,
        out_specs=out_spec,
        compiler_params=pltpu.CompilerParams(
            dimension_semantics=("parallel",)),
        cost_estimate=pl.CostEstimate(
            flops=flops, transcendentals=0, bytes_accessed=bytes_accessed),
    )(x, *flat)


def mlp_forward(params, x):
    """Matches MLP.forward: (Linear -> ReLU) * len(hidden_size), then
    Linear(hidden_size[-1], 1) with no activation. One fused Pallas call."""
    flat = prepare_mlp_params(params)
    return _mlp_forward_jit(x, flat, n_hidden=len(params) - 1)


def init_mlp_params(key, input_size, hidden_size):
    """Deterministic init mirroring PyTorch nn.Linear default:
    U(-1/sqrt(fan_in), 1/sqrt(fan_in)) for both weight and bias."""
    sizes = [input_size] + list(hidden_size) + [1]
    params = []
    for i in range(len(sizes) - 1):
        fan_in, fan_out = sizes[i], sizes[i + 1]
        key, kw, kb = jax.random.split(key, 3)
        bound = 1.0 / jnp.sqrt(fan_in)
        # stored as [in, out] (transpose of torch's [out, in])
        w = jax.random.uniform(kw, (fan_in, fan_out), jnp.float32,
                               minval=-bound, maxval=bound)
        b = jax.random.uniform(kb, (fan_out,), jnp.float32,
                               minval=-bound, maxval=bound)
        params.append((w, b))
    return params


if __name__ == "__main__":
    input_size = 16
    hidden_size = [32, 32]
    batch = 8

    key = jax.random.PRNGKey(0)
    key, kx = jax.random.split(key)
    x = jax.random.normal(kx, (batch, input_size), jnp.float32)

    params = init_mlp_params(key, input_size, hidden_size)

    # Hoisted param prep + jitted forward (launch-overhead fix).
    flat = prepare_mlp_params(params)
    out = _mlp_forward_jit(x, flat, n_hidden=len(params) - 1)
    out = jax.block_until_ready(out)

    # Pure-JAX reference check of the same math.
    ref = x
    for idx, (w, b) in enumerate(params):
        ref = ref @ w + b
        if idx != len(params) - 1:
            ref = jnp.maximum(ref, 0.0)
    assert out.shape == (batch, 1)
    assert jnp.allclose(out, ref, atol=1e-5, rtol=1e-5)

    print("KERNEL_OK")
</pallas_src>

<mosaic_0001>
module attributes {stable_mosaic.version = 11 : i64} {
  func.func @_fused_mlp_kernel(%arg0: i32, %arg1: memref<8x16xf32, #tpu.memory_space<vmem>>, %arg2: memref<16x32xf32, #tpu.memory_space<vmem>>, %arg3: memref<1x32xf32, #tpu.memory_space<vmem>>, %arg4: memref<32x32xf32, #tpu.memory_space<vmem>>, %arg5: memref<1x32xf32, #tpu.memory_space<vmem>>, %arg6: memref<1x32xf32, #tpu.memory_space<vmem>>, %arg7: memref<1x1xf32, #tpu.memory_space<vmem>>, %arg8: memref<8x1xf32, #tpu.memory_space<vmem>>) attributes {dimension_semantics = [#tpu.dimension_semantics<parallel>], iteration_bounds = array<i64: 1>, scalar_prefetch = 0 : i64, scratch_operands = 0 : i64, tpu.core_type = #tpu.core_type<tc>, window_params = [{transform_indices = @transform_0, window_bounds = array<i64: 8, 16>}, {pipeline_mode = #tpu.pipeline_mode<synchronous>, transform_indices = @transform_1, window_bounds = array<i64: 16, 32>}, {pipeline_mode = #tpu.pipeline_mode<synchronous>, transform_indices = @transform_2, window_bounds = array<i64: 1, 32>}, {pipeline_mode = #tpu.pipeline_mode<synchronous>, transform_indices = @transform_3, window_bounds = array<i64: 32, 32>}, {pipeline_mode = #tpu.pipeline_mode<synchronous>, transform_indices = @transform_4, window_bounds = array<i64: 1, 32>}, {pipeline_mode = #tpu.pipeline_mode<synchronous>, transform_indices = @transform_5, window_bounds = array<i64: 1, 32>}, {pipeline_mode = #tpu.pipeline_mode<synchronous>, transform_indices = @transform_6, window_bounds = array<i64: 1, 1>}, {transform_indices = @transform_7, window_bounds = array<i64: 8, 1>}]} {
    %c0 = arith.constant 0 : index
    %c0_0 = arith.constant 0 : index
    %0 = vector.load %arg1[%c0, %c0_0] : memref<8x16xf32, #tpu.memory_space<vmem>>, vector<8x16xf32>
    %c0_1 = arith.constant 0 : index
    %c0_2 = arith.constant 0 : index
    %1 = vector.load %arg2[%c0_1, %c0_2] : memref<16x32xf32, #tpu.memory_space<vmem>>, vector<16x32xf32>
    %c0_3 = arith.constant 0 : index
    %c0_4 = arith.constant 0 : index
    %2 = vector.load %arg3[%c0_3, %c0_4] : memref<1x32xf32, #tpu.memory_space<vmem>>, vector<1x32xf32>
    %cst = arith.constant dense<0.000000e+00> : vector<8x32xf32>
    %3 = tpu.matmul %0, %1, %cst {dimension_numbers = #tpu.dot_dimension_numbers<[1], [0], [0], [1], [0, 0, 1, 1], [], []>} : vector<8x16xf32>, vector<16x32xf32>, vector<8x32xf32> -> vector<8x32xf32>
    %4 = vector.broadcast %2 : vector<1x32xf32> to vector<8x32xf32>
    %5 = arith.addf %3, %4 : vector<8x32xf32>
    %cst_5 = arith.constant 0.000000e+00 : f32
    %6 = vector.broadcast %cst_5 : f32 to vector<8x32xf32>
    %7 = arith.maximumf %5, %6 : vector<8x32xf32>
    %c0_6 = arith.constant 0 : index
    %c0_7 = arith.constant 0 : index
    %8 = vector.load %arg4[%c0_6, %c0_7] : memref<32x32xf32, #tpu.memory_space<vmem>>, vector<32x32xf32>
    %c0_8 = arith.constant 0 : index
    %c0_9 = arith.constant 0 : index
    %9 = vector.load %arg5[%c0_8, %c0_9] : memref<1x32xf32, #tpu.memory_space<vmem>>, vector<1x32xf32>
    %cst_10 = arith.constant dense<0.000000e+00> : vector<8x32xf32>
    %10 = tpu.matmul %7, %8, %cst_10 {dimension_numbers = #tpu.dot_dimension_numbers<[1], [0], [0], [1], [0, 0, 1, 1], [], []>} : vector<8x32xf32>, vector<32x32xf32>, vector<8x32xf32> -> vector<8x32xf32>
    %11 = vector.broadcast %9 : vector<1x32xf32> to vector<8x32xf32>
    %12 = arith.addf %10, %11 : vector<8x32xf32>
    %cst_11 = arith.constant 0.000000e+00 : f32
    %13 = vector.broadcast %cst_11 : f32 to vector<8x32xf32>
    %14 = arith.maximumf %12, %13 : vector<8x32xf32>
    %c0_12 = arith.constant 0 : index
    %c0_13 = arith.constant 0 : index
    %15 = vector.load %arg6[%c0_12, %c0_13] : memref<1x32xf32, #tpu.memory_space<vmem>>, vector<1x32xf32>
    %c0_14 = arith.constant 0 : index
    %c0_15 = arith.constant 0 : index
    %16 = vector.load %arg7[%c0_14, %c0_15] : memref<1x1xf32, #tpu.memory_space<vmem>>, vector<1x1xf32>
    %17 = vector.broadcast %15 : vector<1x32xf32> to vector<8x32xf32>
    %18 = arith.mulf %14, %17 : vector<8x32xf32>
    %cst_16 = arith.constant dense<0.000000e+00> : vector<8xf32>
    %19 = vector.multi_reduction <add>, %18, %cst_16 [1] : vector<8x32xf32> to vector<8xf32>
    %20 = vector.shape_cast %19 : vector<8xf32> to vector<8x1xf32>
    %21 = vector.broadcast %16 : vector<1x1xf32> to vector<8x1xf32>
    %22 = arith.addf %20, %21 : vector<8x1xf32>
    %c0_17 = arith.constant 0 : index
    %c0_18 = arith.constant 0 : index
    %23 = vector.load %arg8[%c0_17, %c0_18] : memref<8x1xf32, #tpu.memory_space<vmem>>, vector<8x1xf32>
    tpu.vector_store %arg8[%c0_17, %c0_18], %22 {strides = array<i32>} : memref<8x1xf32, #tpu.memory_space<vmem>>, vector<8x1xf32>,
    return
  }
  func.func @transform_0(%arg0: i32) -> (i32, i32) {
    %c0_i32 = arith.constant 0 : i32
    %c0_i32_0 = arith.constant 0 : i32
    return %arg0, %c0_i32 : i32, i32
  }
  func.func @transform_1(%arg0: i32) -> (i32, i32) {
    %c0_i32 = arith.constant 0 : i32
    %c0_i32_0 = arith.constant 0 : i32
    %c0_i32_1 = arith.constant 0 : i32
    return %c0_i32, %c0_i32_0 : i32, i32
  }
  func.func @transform_2(%arg0: i32) -> (i32, i32) {
    %c0_i32 = arith.constant 0 : i32
    %c0_i32_0 = arith.constant 0 : i32
    %c0_i32_1 = arith.constant 0 : i32
    return %c0_i32, %c0_i32_0 : i32, i32
  }
  func.func @transform_3(%arg0: i32) -> (i32, i32) {
    %c0_i32 = arith.constant 0 : i32
    %c0_i32_0 = arith.constant 0 : i32
    %c0_i32_1 = arith.constant 0 : i32
    return %c0_i32, %c0_i32_0 : i32, i32
  }
  func.func @transform_4(%arg0: i32) -> (i32, i32) {
    %c0_i32 = arith.constant 0 : i32
    %c0_i32_0 = arith.constant 0 : i32
    %c0_i32_1 = arith.constant 0 : i32
    return %c0_i32, %c0_i32_0 : i32, i32
  }
  func.func @transform_5(%arg0: i32) -> (i32, i32) {
    %c0_i32 = arith.constant 0 : i32
    %c0_i32_0 = arith.constant 0 : i32
    %c0_i32_1 = arith.constant 0 : i32
    return %c0_i32, %c0_i32_0 : i32, i32
  }
  func.func @transform_6(%arg0: i32) -> (i32, i32) {
    %c0_i32 = arith.constant 0 : i32
    %c0_i32_0 = arith.constant 0 : i32
    %c0_i32_1 = arith.constant 0 : i32
    return %c0_i32, %c0_i32_0 : i32, i32
  }
  func.func @transform_7(%arg0: i32) -> (i32, i32) {
    %c0_i32 = arith.constant 0 : i32
    %c0_i32_0 = arith.constant 0 : i32
    return %arg0, %c0_i32 : i32, i32
  }
}

</mosaic_0001>

<bundles_post_ra>
// kernel: _mlp_forward_jit.1
= control target key start
LH: loop header
LB: loop body
LE: loop exit
PB: predicated region body
PF: predicated region fallthrough
CT: control target
= control target key end

     0   :  { %s439_s0 = inlined_call_operand.hbm [shape: f32[8,16], index: 0, kind: input, shape index: {}]   ;;  %s440_s1 = inlined_call_operand.hbm [shape: f32[16,32], index: 1, kind: input, shape index: {}]   ;;  %s441_s2 = inlined_call_operand.vmem [shape: f32[1,32], index: 2, kind: input, shape index: {}]   ;;  %s442_s3 = inlined_call_operand.hbm [shape: f32[32,32], index: 3, kind: input, shape index: {}]   ;;  %s443_s4 = inlined_call_operand.vmem [shape: f32[1,32], index: 4, kind: input, shape index: {}]   ;;  %s444_s5 = inlined_call_operand.vmem [shape: f32[1,32], index: 5, kind: input, shape index: {}]   ;;  %s445_s6 = inlined_call_operand.<no memory space> [shape: f32[1,1], index: 6, kind: input, shape index: {}]   ;;  %s446_s7 = inlined_call_operand.vmem [shape: f32[8,1], index: 7, kind: output, shape index: {}]  }
   0x1   :  { %v12_v0 = vstv %s445_s6 }
   0x2   :  { %13 = vst [vmem:[#allocation2] sm:$0x1] %v12_v0 }
   0x3   :  { %14 = vsyncpa [#allocation4], 0 }
   0x4   :  { %15 = vsyncpa [#allocation6], 0  ;;  %s368_s26 = smov [#allocation5]  }
   0x5   :  { %s31_s27 = sshll.u32 %s368_s26, 4  ;;  %s32_s27 = int_to_ptr.vmem [resolvable:$true] %s31_s27 }
   0x6   :  { %s312_s28 = scalar_lea.vmem %s32_s27, 256  ;;  %p317_p1 = scmp.lt.s32.totalorder %s32_s27, %s32_s27 }
   0x7   :  { %p313_p0 = scmp.ne.s32.totalorder %s32_s27, %s312_s28  ;;  %p318_p2 = scmp.lt.s32.totalorder %s312_s28, %s312_s28 }
   0x9   :  { %p319_p3 = por %p318_p2, %p317_p1 }
   0xb   :  { %p320_p4 = pnand %p319_p3, %p313_p0 }
   0xd   :  { %323 = shalt.err (!%p320_p4)
}
   0xe   :  { %s369_s29 = smov 128   ;;  %s370_s30 = smov 8  }
   0xf   :  { %37 = dma.hbm_to_vmem [thread:$0]  %s440_s1, 256, %s32_s27, [#allocation6], %s369_s29, %s369_s29, %s370_s30  }
  0x10   :  { %s371_s6 = smov [#allocation3]   ;;  %s372_s11 = smov [#allocation7]  }
  0x11   :  { %s22_s10 = sshll.u32 %s371_s6, 4  ;;  %s45_s12 = sshll.u32 %s372_s11, 4  ;;  %s23_s10 = int_to_ptr.vmem [resolvable:$true] %s22_s10  ;;  %s46_s12 = int_to_ptr.vmem [resolvable:$true] %s45_s12 }
  0x12   :  { %s332_s13 = scalar_lea.vmem %s23_s10, 128  ;;  %p337_p6 = scmp.lt.s32.totalorder %s23_s10, %s23_s10 }
  0x13   :  { %p333_p5 = scmp.ne.s32.totalorder %s23_s10, %s332_s13  ;;  %p338_p7 = scmp.lt.s32.totalorder %s332_s13, %s332_s13 }
  0x15   :  { %p339_p8 = por %p338_p7, %p337_p6 }
  0x17   :  { %p340_p9 = pnand %p339_p8, %p333_p5 }
  0x19   :  { %343 = shalt.err (!%p340_p9)
}
  0x1a   :  { %25 = dma.hbm_to_vmem [thread:$0]  %s439_s0, 128, %s23_s10, [#allocation4]  }
  0x1b   :  { %s352_s16 = scalar_lea.vmem %s46_s12, 512  ;;  %p357_p11 = scmp.lt.s32.totalorder %s46_s12, %s46_s12 }
  0x1c   :  { %p353_p10 = scmp.ne.s32.totalorder %s46_s12, %s352_s16  ;;  %p358_p12 = scmp.lt.s32.totalorder %s352_s16, %s352_s16 }
  0x1e   :  { %p359_p13 = por %p358_p12, %p357_p11 }
  0x20   :  { %p360_p0 = pnand %p359_p13, %p353_p10 }
  0x22   :  { %363 = shalt.err (!%p360_p0)
}
  0x23   :  { %51 = dma.hbm_to_vmem [thread:$0]  %s442_s3, 512, %s46_s12, [#allocation6], %s369_s29, %s369_s29, %s370_s30  }
  0x24   :  { %364 = dma.done.wait [#allocation4], 128  }
  0x25   :  { %365 = vsyncadd [#allocation4], 4294967168 }
  0x26   :  { %366 = dma.done.wait [#allocation6], 768  }
  0x27   :  { %367 = vsyncadd [#allocation6], 4294966528  ;;  %v373_v1 = vmov 0.0   ;;  %vm374_vm0 = vmmov 0   ;;  %v69_v2 = vld [vmem:[#allocation5 + $0x8] sm:$0xff]  ;;  %v68_v3 = vld [vmem:[#allocation5] sm:$0xff] }
  0x28   :  { %279 = vmatprep.subr.mxu0 %v373_v1  ;;  %283 = vmatprep.mubr.msk.f32.mxu0 %vm374_vm0, %v373_v1  ;;  %v67_v4 = vld [vmem:[#allocation3] sm:$0xff]  ;;  %vm77_vm1 = vcmask 130048   ;;  %v155_v5 = vld [vmem:[#allocation7 + $0x18] sm:$0xff]  ;;  %v154_v6 = vld [vmem:[#allocation7 + $0x10] sm:$0xff]  ;;  %vm163_vm2 = vcmask 261120   ;;  %vm257_vm3 = vcmask 7168  }
  0x29   :  { %286 = vmatprep.subr.mxu1 %v373_v1  ;;  %294 = vmatprep.mubr.msk.f32.mxu1 %vm374_vm0, %v373_v1  ;;  %v153_v7 = vld [vmem:[#allocation7 + $0x8] sm:$0xff]  ;;  %v152_v8 = vld [vmem:[#allocation7] sm:$0xff] }
  0x2a   :  { %280 = vmatpush3.msra.mxu0 %v69_v2  ;;  %287 = vmatpush3.msra.mxu1 %v155_v5  ;;  %v265_v9 = vld [vmem:[%s441_s2] ss:$0 sm:$0xff] }
  0x2b   :  { %281 = vmatprep.subr.mxu0 %v373_v1  ;;  %288 = vmatprep.subr.mxu1 %v373_v1  ;;  %v267_v14 = vld [vmem:[%s443_s4] ss:$0 sm:$0xff] }
  0x2c   :  { %282 = vmatpush3.msra.mxu0 %v68_v3  ;;  %289 = vmatpush3.msra.mxu1 %v154_v6  ;;  %v269_v18 = vld [vmem:[%s444_s5] ss:$0 sm:$0xff] }
  0x2d   :  { %284 = vmatmul.mubr.msk.f32.vlgmr.msra.gmra.mxu0 %vm77_vm1, %v67_v4  ;;  %290 = vmatprep.subr.mxu1 %v373_v1  ;;  %v270_v22 = vld [vmem:[#allocation2] ss:$0 sm:$0xff] }
  0x2e   :  { %291 = vmatpush3.msra.mxu1 %v153_v7 }
  0x2f   :  { %292 = vmatprep.subr.mxu1 %v373_v1 }
  0x30   :  { %293 = vmatpush3.msra.mxu1 %v152_v8 }
  0xed   :  { %v147_v10 = vpop.f32.mrf.mxu0 }
  0xee   :  { %v148_v11 = vadd.f32 %v265_v9, %v147_v10 }
  0xef   :  { %v285_v12 = vpop.f32.mrf.mxu0 }
  0xf0   :  { %v151_v13 = vmax.f32 %v148_v11, 0.0 }
  0xf2   :  { %295 = vmatmul.mubr.msk.f32.vlgmr.msra.gmra.mxu1 %vm163_vm2, %v151_v13 }
 0x1b2   :  { %v233_v15 = vpop.f32.mrf.mxu1 }
 0x1b3   :  { %v234_v16 = vadd.f32 %v267_v14, %v233_v15 }
 0x1b4   :  { %v296_v17 = vpop.f32.mrf.mxu1 }
 0x1b5   :  { %v237_v19 = vmax.f32 %v234_v16, 0.0 }
 0x1b7   :  { %v246_v20 = vmul.f32 %v269_v18, %v237_v19 }
 0x1b9   :  { %v247_v21 = vsel %vm163_vm2, %v246_v20, 0.0 }
 0x1ba   :  { %248 = vadd.xlane.f32.xlu0 %v247_v21 }
 0x243   :  { %v249_v23 = vpop.xlane.xlu0 %248 }
 0x244   :  { %v256_v24 = vadd.f32 %v270_v22, %v249_v23 }
 0x246   :  { %258 = vst.msk [vmem:[%s446_s7] sm:$0xff] %vm257_vm3, %v256_v24 }
 0x247   :  { %263 = vsyncpa [#allocation4], 1 }
 0x248   :  { %264 = vsyncpa [#allocation6], 1 }

</bundles_post_ra>
